<compile_context>
chip_gen: v6e
topology: v6e:2x2x1
jax: 0.10.0
libtpu: 0.0.40
codegen_flags: <defaults>
</compile_context>

<pallas_src>
import functools

import jax
import jax.numpy as jnp
from jax import lax
from jax.experimental import pallas as pl
from jax.experimental.pallas import tpu as pltpu


_N_CHUNK = 128  # rows of N streamed per pooled-reduction step (lane aligned)


def _self_attention_ed_kernel(has_bias, return_attn, *refs):
    """One grid step == TB batch elements.

    Ref order: relation (TB,N,dim), ed_pre (TB,N,D), [bias (TB,N)],
               a (dim,da), b_row (1,da), out (TB,D), [attn (TB,N)],
               attn_sc VMEM scratch (TB,N) f32.
    """
    it = iter(refs)
    rel_ref = next(it)
    ed_ref = next(it)
    bias_ref = next(it) if has_bias else None
    a_ref = next(it)
    brow_ref = next(it)
    out_ref = next(it)
    attn_ref = next(it) if return_attn else None
    attn_sc = next(it)

    tb, n, dim = rel_ref.shape
    da = a_ref.shape[1]
    d_out = ed_ref.shape[2]

    # e = tanh(relation @ a) @ b ; the 1-wide second matmul is done on the VPU
    # as an elementwise multiply with the b row + lane reduction (no wasted
    # MXU push/pop).
    rel2 = rel_ref[...].reshape(tb * n, dim)                         # (TB*N, dim)
    h = jnp.tanh(jnp.dot(rel2, a_ref[...],
                         preferred_element_type=jnp.float32))        # (TB*N, da) f32
    e = jnp.sum(h.reshape(tb, n, da) * brow_ref[...], axis=-1)       # (TB, N) f32
    if has_bias:
        e = e + bias_ref[...].astype(jnp.float32)

    # Softmax over N (PyTorch: F.softmax(e, dim=1)); exact reciprocal so the
    # returned attention rows sum to 1.
    e_max = jnp.max(e, axis=-1, keepdims=True)                       # (TB, 1)
    p = jnp.exp(e - e_max)
    denom = jnp.sum(p, axis=-1, keepdims=True)
    attn = p * pl.reciprocal(denom, approx=False)                    # (TB, N) f32

    if return_attn:
        attn_ref[...] = attn.astype(attn_ref.dtype)

    # pooled[b, :] = attn[b, :] @ ed[b, :, :]
    # Streamed in N-chunks accumulating into a (TB, D) f32 accumulator so only
    # a (TB, n_chunk, D) f32 slice lives in VMEM at any time.
    def chunk_sum(a_c, e_c):
        # a_c: (TB, nc) f32 ; e_c: (TB, nc, D) native dtype -> (TB, D) f32
        return jnp.sum(a_c[:, :, None] * e_c.astype(jnp.float32), axis=1)

    if n <= _N_CHUNK:
        pooled = chunk_sum(attn, ed_ref[...])
    else:
        attn_sc[...] = attn                     # lane-aligned ref for chunk reads
        num_full = n // _N_CHUNK
        rem = n - num_full * _N_CHUNK

        def body(c, acc):
            s = pl.multiple_of(c * _N_CHUNK, _N_CHUNK)
            return acc + chunk_sum(attn_sc[:, pl.ds(s, _N_CHUNK)],
                                   ed_ref[:, pl.ds(s, _N_CHUNK), :])

        pooled = lax.fori_loop(0, num_full, body,
                               jnp.zeros((tb, d_out), jnp.float32))
        if rem > 0:
            pooled = pooled + chunk_sum(attn_sc[:, num_full * _N_CHUNK:],
                                        ed_ref[:, num_full * _N_CHUNK:, :])

    out_ref[...] = pooled.astype(out_ref.dtype)


def _tile_footprint_bytes(tb, N, dim, D, da, in_isz, out_isz, bias_isz,
                          has_bias, return_attn):
    """Honest per-step VMEM estimate: double-buffered pipeline blocks plus
    kernel-internal f32 intermediates and scratch."""
    blocks = 2 * tb * N * dim * in_isz                 # relation (dbl-buffered)
    blocks += 2 * tb * N * D * in_isz                  # ed_pre
    if has_bias:
        blocks += 2 * tb * N * bias_isz                # mask bias
    blocks += 2 * tb * D * out_isz                     # pooled output
    if return_attn:
        blocks += 2 * tb * N * 4                       # attention output (f32)
    blocks += 2 * (dim * da * in_isz + da * 4)         # weights (small, shared)

    scratch = tb * N * 4                               # attn_sc VMEM scratch

    nc = min(N, _N_CHUNK)
    interm = 2 * tb * N * da * 4                       # h and h*b_row (f32)
    interm += 4 * tb * N * 4                           # e / p / attn / temps
    interm += tb * nc * D * 4                          # per-chunk f32 product
    interm += 2 * tb * D * 4                           # accumulator + pooled

    return blocks + scratch + interm


def _vmem_budgets():
    """Generation-aware scoped-VMEM limit and tile budget."""
    phys = 64 << 20                                    # conservative: v7x per-core
    try:
        info = pltpu.get_tpu_info()
        cap = getattr(info, "vmem_capacity_bytes", None)
        if cap:
            phys = int(cap)
    except Exception:
        pass
    limit = min(phys // 2, 64 << 20)                   # v7x: 32 MiB, v5e/v6e: 64 MiB
    budget = (limit * 3) // 4                          # headroom for compiler temps
    return budget, limit


def _choose_batch_tile(B, N, dim, D, da, in_isz, out_isz, bias_isz,
                       has_bias, return_attn, budget_bytes, limit_bytes):
    def fp(t):
        return _tile_footprint_bytes(t, N, dim, D, da, in_isz, out_isz,
                                     bias_isz, has_bias, return_attn)

    # Legal tiles divide B evenly and keep the 2-D bias/out/attn blocks
    # sublane-aligned (tb % 8 == 0) unless the block spans the full batch.
    legal = sorted({t for t in range(8, B + 1, 8) if B % t == 0} | {B})
    fitting = [t for t in legal if fp(t) <= budget_bytes]
    if fitting:
        # Prefer >= 2 grid steps so both v7x TensorCores get work (costs one
        # extra ~0.35us grid step elsewhere — negligible).
        multi = [t for t in fitting if B // t >= 2]
        return max(multi) if multi else max(fitting)

    t = min(legal)
    if fp(t) > limit_bytes:
        # TODO(synk): add an N-tiling fallback (second grid axis with a running
        # softmax) for configs whose smallest legal batch tile overflows VMEM.
        raise ValueError(
            f"SelfAttentionEd: smallest batch tile tb={t} needs ~{fp(t)} bytes "
            f"of VMEM which exceeds the limit {limit_bytes}; shrink N/dim/D or "
            f"add N-tiling.")
    return t


def self_attention_ed(relation, ed_pre, a, b, mask=None, return_logits=False):
    """Pallas implementation of SelfAttentionEd.forward."""
    B, N, dim = relation.shape
    _, _, D = ed_pre.shape
    da = a.shape[1]

    # Activations stream in their native dtype (this kernel touches every
    # element of relation/ed_pre exactly once -> HBM-bandwidth bound).  The
    # weight a follows the activation dtype so the MXU runs at native rate;
    # accumulation is forced to f32 in the kernel.
    a = a.astype(relation.dtype)
    b_row = b.reshape(1, da).astype(jnp.float32)

    has_bias = mask is not None
    if has_bias:
        # bf16 represents -1e30 fine (same exponent range as f32), so the bias
        # follows the activation dtype to halve its HBM read when inputs are
        # bf16; the in-kernel add happens in f32.
        mask_b = mask.astype(bool)
        full_mask = -1e30 * mask_b.astype(jnp.float32)
        # Rows that are entirely padding get a zero bias -> uniform softmax,
        # matching the PyTorch reference semantics.
        batch_mask = (jnp.sum(~mask_b, axis=-1) != 0).astype(jnp.float32)
        bias = (full_mask * batch_mask[:, None]).astype(relation.dtype)
        bias_isz = bias.dtype.itemsize
    else:
        bias = None
        bias_isz = 0

    budget, limit = _vmem_budgets()
    tb = _choose_batch_tile(B, N, dim, D, da,
                            relation.dtype.itemsize, ed_pre.dtype.itemsize,
                            bias_isz, has_bias, return_logits, budget, limit)
    grid = (B // tb,)

    in_specs = [
        pl.BlockSpec((tb, N, dim), lambda i: (i, 0, 0)),    # relation
        pl.BlockSpec((tb, N, D), lambda i: (i, 0, 0)),      # ed_pre
    ]
    args = [relation, ed_pre]
    if has_bias:
        in_specs.append(pl.BlockSpec((tb, N), lambda i: (i, 0)))
        args.append(bias)
    in_specs += [
        pl.BlockSpec((dim, da), lambda i: (0, 0)),          # a (shared)
        pl.BlockSpec((1, da), lambda i: (0, 0)),            # b row (shared)
    ]
    args += [a, b_row]

    if return_logits:
        out_shape = (jax.ShapeDtypeStruct((B, D), ed_pre.dtype),
                     jax.ShapeDtypeStruct((B, N), jnp.float32))
        out_specs = (pl.BlockSpec((tb, D), lambda i: (i, 0)),
                     pl.BlockSpec((tb, N), lambda i: (i, 0)))
    else:
        out_shape = jax.ShapeDtypeStruct((B, D), ed_pre.dtype)
        out_specs = pl.BlockSpec((tb, D), lambda i: (i, 0))

    bias_bytes = bias.size * bias.dtype.itemsize if has_bias else 0
    attn_bytes = B * N * 4 if return_logits else 0
    cost = pl.CostEstimate(
        flops=2 * B * N * dim * da + 2 * B * N * da + 2 * B * N * D,
        transcendentals=B * N * da + B * N,
        bytes_accessed=(relation.size * relation.dtype.itemsize
                        + ed_pre.size * ed_pre.dtype.itemsize
                        + bias_bytes
                        + a.size * a.dtype.itemsize + b_row.size * 4
                        + B * D * ed_pre.dtype.itemsize + attn_bytes),
    )

    kernel = functools.partial(_self_attention_ed_kernel, has_bias, return_logits)
    result = pl.pallas_call(
        kernel,
        out_shape=out_shape,
        grid_spec=pltpu.PrefetchScalarGridSpec(
            num_scalar_prefetch=0,
            grid=grid,
            in_specs=in_specs,
            out_specs=out_specs,
            scratch_shapes=[pltpu.VMEM((tb, N), jnp.float32)],
        ),
        compiler_params=pltpu.CompilerParams(
            dimension_semantics=("parallel",),   # batch tiles: megacore-shardable
            vmem_limit_bytes=limit,
        ),
        cost_estimate=cost,
    )(*args)

    return result  # (pooled, attention) if return_logits else pooled


def _xavier_uniform(key, shape, gain):
    fan_in, fan_out = shape[0], shape[1]
    bound = gain * jnp.sqrt(6.0 / (fan_in + fan_out))
    return jax.random.uniform(key, shape, jnp.float32, -bound, bound)


def _reference(relation, ed_pre, a, b, mask=None):
    relation = relation.astype(jnp.float32)
    ed_pre = ed_pre.astype(jnp.float32)
    e = jnp.matmul(jnp.tanh(jnp.matmul(relation, a.astype(jnp.float32))),
                   b.astype(jnp.float32))                          # (B, N, 1)
    if mask is not None:
        mask = mask.astype(bool)
        full_mask = -1e30 * mask.astype(jnp.float32)
        batch_mask = (jnp.sum(~mask, -1) != 0).astype(jnp.float32)[:, None]
        e = e + (full_mask * batch_mask)[..., None]
    attention = jax.nn.softmax(e, axis=1)
    pooled = jnp.matmul(jnp.swapaxes(attention, 1, 2), ed_pre)[:, 0, :]
    return pooled, attention[:, :, 0]


if __name__ == "__main__":
    # --- small shapes consistent with the module (B=2, N=8, dim=32, da=16, D=32)
    B, N, dim, da, D = 2, 8, 32, 16, 32
    key = jax.random.PRNGKey(0)
    k_rel, k_ed, k_a, k_b = jax.random.split(key, 4)

    relation = jax.random.normal(k_rel, (B, N, dim), jnp.float32)
    ed_pre = jax.random.normal(k_ed, (B, N, D), jnp.float32)
    a_param = _xavier_uniform(k_a, (dim, da), gain=1.414)   # xavier_uniform_(gain=1.414)
    b_param = _xavier_uniform(k_b, (da, 1), gain=1.414)
    mask = jnp.zeros((B, N), dtype=bool).at[1, -2:].set(True)   # padding positions

    # Masked path with attention logits.
    out, attn = self_attention_ed(relation, ed_pre, a_param, b_param,
                                  mask=mask, return_logits=True)
    out, attn = jax.block_until_ready((out, attn))
    ref_out, ref_attn = _reference(relation, ed_pre, a_param, b_param, mask=mask)
    assert out.shape == (B, D) and attn.shape == (B, N)
    assert jnp.allclose(out, ref_out, atol=3e-3, rtol=3e-3), "pooled mismatch"
    assert jnp.allclose(attn, ref_attn, atol=3e-3, rtol=3e-3), "attn mismatch"

    # Unmasked, pooled-only path (no bias input, no attention output declared).
    out2 = self_attention_ed(relation, ed_pre, a_param, b_param)
    out2 = jax.block_until_ready(out2)
    ref_out2, _ = _reference(relation, ed_pre, a_param, b_param)
    assert jnp.allclose(out2, ref_out2, atol=3e-3, rtol=3e-3), "no-mask mismatch"

    # Larger config exercising the chunked-N pooled reduction and a 2-step grid.
    B2, N2, dim2, da2, D2 = 16, 160, 64, 32, 64
    k_rel2, k_ed2, k_a2, k_b2, k_m2 = jax.random.split(jax.random.PRNGKey(1), 5)
    relation2 = jax.random.normal(k_rel2, (B2, N2, dim2), jnp.float32)
    ed_pre2 = jax.random.normal(k_ed2, (B2, N2, D2), jnp.float32)
    a2 = _xavier_uniform(k_a2, (dim2, da2), gain=1.414)
    b2 = _xavier_uniform(k_b2, (da2, 1), gain=1.414)
    mask2 = jax.random.bernoulli(k_m2, 0.2, (B2, N2))
    out3, attn3 = self_attention_ed(relation2, ed_pre2, a2, b2,
                                    mask=mask2, return_logits=True)
    out3, attn3 = jax.block_until_ready((out3, attn3))
    ref_out3, ref_attn3 = _reference(relation2, ed_pre2, a2, b2, mask=mask2)
    assert jnp.allclose(out3, ref_out3, atol=3e-3, rtol=3e-3), "chunked pooled mismatch"
    assert jnp.allclose(attn3, ref_attn3, atol=3e-3, rtol=3e-3), "chunked attn mismatch"

    # TODO(synk): the dropout attribute is stored but never applied in the
    # PyTorch forward, so it is intentionally not implemented here.
    print("KERNEL_OK")
</pallas_src>

<mosaic_0001>
module attributes {stable_mosaic.version = 11 : i64} {
  func.func @_self_attention_ed_kernel(%arg0: i32, %arg1: memref<2x8x32xf32, #tpu.memory_space<vmem>>, %arg2: memref<2x8x32xf32, #tpu.memory_space<vmem>>, %arg3: memref<2x8xf32, #tpu.memory_space<vmem>>, %arg4: memref<32x16xf32, #tpu.memory_space<vmem>>, %arg5: memref<1x16xf32, #tpu.memory_space<vmem>>, %arg6: memref<2x32xf32, #tpu.memory_space<vmem>>, %arg7: memref<2x8xf32, #tpu.memory_space<vmem>>, %arg8: memref<2x8xf32, #tpu.memory_space<vmem>>) attributes {dimension_semantics = [#tpu.dimension_semantics<parallel>], iteration_bounds = array<i64: 1>, scalar_prefetch = 0 : i64, scratch_operands = 1 : i64, tpu.core_type = #tpu.core_type<tc>, window_params = [{transform_indices = @transform_0, window_bounds = array<i64: 2, 8, 32>}, {transform_indices = @transform_1, window_bounds = array<i64: 2, 8, 32>}, {transform_indices = @transform_2, window_bounds = array<i64: 2, 8>}, {pipeline_mode = #tpu.pipeline_mode<synchronous>, transform_indices = @transform_3, window_bounds = array<i64: 32, 16>}, {pipeline_mode = #tpu.pipeline_mode<synchronous>, transform_indices = @transform_4, window_bounds = array<i64: 1, 16>}, {transform_indices = @transform_5, window_bounds = array<i64: 2, 32>}, {transform_indices = @transform_6, window_bounds = array<i64: 2, 8>}]} {
    %c0 = arith.constant 0 : index
    %c0_0 = arith.constant 0 : index
    %c0_1 = arith.constant 0 : index
    %0 = vector.load %arg1[%c0, %c0_0, %c0_1] : memref<2x8x32xf32, #tpu.memory_space<vmem>>, vector<2x8x32xf32>
    %1 = vector.shape_cast %0 : vector<2x8x32xf32> to vector<16x32xf32>
    %c0_2 = arith.constant 0 : index
    %c0_3 = arith.constant 0 : index
    %2 = vector.load %arg4[%c0_2, %c0_3] : memref<32x16xf32, #tpu.memory_space<vmem>>, vector<32x16xf32>
    %cst = arith.constant dense<0.000000e+00> : vector<16x16xf32>
    %3 = tpu.matmul %1, %2, %cst {dimension_numbers = #tpu.dot_dimension_numbers<[1], [0], [0], [1], [0, 0, 1, 1], [], []>} : vector<16x32xf32>, vector<32x16xf32>, vector<16x16xf32> -> vector<16x16xf32>
    %4 = math.tanh %3 : vector<16x16xf32>
    %5 = vector.shape_cast %4 : vector<16x16xf32> to vector<2x8x16xf32>
    %c0_4 = arith.constant 0 : index
    %c0_5 = arith.constant 0 : index
    %6 = vector.load %arg5[%c0_4, %c0_5] : memref<1x16xf32, #tpu.memory_space<vmem>>, vector<1x16xf32>
    %7 = vector.shape_cast %6 : vector<1x16xf32> to vector<1x1x16xf32>
    %8 = vector.broadcast %7 : vector<1x1x16xf32> to vector<2x8x16xf32>
    %9 = arith.mulf %5, %8 : vector<2x8x16xf32>
    %cst_6 = arith.constant dense<0.000000e+00> : vector<2x8xf32>
    %10 = vector.multi_reduction <add>, %9, %cst_6 [2] : vector<2x8x16xf32> to vector<2x8xf32>
    %c0_7 = arith.constant 0 : index
    %c0_8 = arith.constant 0 : index
    %11 = vector.load %arg3[%c0_7, %c0_8] : memref<2x8xf32, #tpu.memory_space<vmem>>, vector<2x8xf32>
    %12 = arith.addf %10, %11 : vector<2x8xf32>
    %cst_9 = arith.constant dense<0xFF800000> : vector<2xf32>
    %13 = vector.multi_reduction <maximumf>, %12, %cst_9 [1] : vector<2x8xf32> to vector<2xf32>
    %14 = vector.shape_cast %13 : vector<2xf32> to vector<2x1xf32>
    %15 = vector.broadcast %14 : vector<2x1xf32> to vector<2x8xf32>
    %16 = arith.subf %12, %15 : vector<2x8xf32>
    %17 = math.exp %16 : vector<2x8xf32>
    %cst_10 = arith.constant dense<0.000000e+00> : vector<2xf32>
    %18 = vector.multi_reduction <add>, %17, %cst_10 [1] : vector<2x8xf32> to vector<2xf32>
    %19 = vector.shape_cast %18 : vector<2xf32> to vector<2x1xf32>
    %20 = tpu.reciprocal %19 : vector<2x1xf32> -> vector<2x1xf32>
    %21 = vector.broadcast %20 : vector<2x1xf32> to vector<2x8xf32>
    %22 = arith.mulf %17, %21 : vector<2x8xf32>
    %c0_11 = arith.constant 0 : index
    %c0_12 = arith.constant 0 : index
    %23 = vector.load %arg7[%c0_11, %c0_12] : memref<2x8xf32, #tpu.memory_space<vmem>>, vector<2x8xf32>
    tpu.vector_store %arg7[%c0_11, %c0_12], %22 {strides = array<i32>} : memref<2x8xf32, #tpu.memory_space<vmem>>, vector<2x8xf32>,
    %c0_13 = arith.constant 0 : index
    %c0_14 = arith.constant 0 : index
    %c0_15 = arith.constant 0 : index
    %24 = vector.load %arg2[%c0_13, %c0_14, %c0_15] : memref<2x8x32xf32, #tpu.memory_space<vmem>>, vector<2x8x32xf32>
    %25 = vector.shape_cast %22 : vector<2x8xf32> to vector<2x8x1xf32>
    %26 = vector.broadcast %25 : vector<2x8x1xf32> to vector<2x8x32xf32>
    %27 = arith.mulf %26, %24 : vector<2x8x32xf32>
    %cst_16 = arith.constant dense<0.000000e+00> : vector<2x32xf32>
    %28 = vector.multi_reduction <add>, %27, %cst_16 [1] : vector<2x8x32xf32> to vector<2x32xf32>
    %c0_17 = arith.constant 0 : index
    %c0_18 = arith.constant 0 : index
    %29 = vector.load %arg6[%c0_17, %c0_18] : memref<2x32xf32, #tpu.memory_space<vmem>>, vector<2x32xf32>
    tpu.vector_store %arg6[%c0_17, %c0_18], %28 {strides = array<i32>} : memref<2x32xf32, #tpu.memory_space<vmem>>, vector<2x32xf32>,
    return
  }
  func.func @transform_0(%arg0: i32) -> (i32, i32, i32) {
    %c0_i32 = arith.constant 0 : i32
    %c0_i32_0 = arith.constant 0 : i32
    %c0_i32_1 = arith.constant 0 : i32
    return %arg0, %c0_i32, %c0_i32_0 : i32, i32, i32
  }
  func.func @transform_1(%arg0: i32) -> (i32, i32, i32) {
    %c0_i32 = arith.constant 0 : i32
    %c0_i32_0 = arith.constant 0 : i32
    %c0_i32_1 = arith.constant 0 : i32
    return %arg0, %c0_i32, %c0_i32_0 : i32, i32, i32
  }
  func.func @transform_2(%arg0: i32) -> (i32, i32) {
    %c0_i32 = arith.constant 0 : i32
    %c0_i32_0 = arith.constant 0 : i32
    return %arg0, %c0_i32 : i32, i32
  }
  func.func @transform_3(%arg0: i32) -> (i32, i32) {
    %c0_i32 = arith.constant 0 : i32
    %c0_i32_0 = arith.constant 0 : i32
    %c0_i32_1 = arith.constant 0 : i32
    return %c0_i32, %c0_i32_0 : i32, i32
  }
  func.func @transform_4(%arg0: i32) -> (i32, i32) {
    %c0_i32 = arith.constant 0 : i32
    %c0_i32_0 = arith.constant 0 : i32
    %c0_i32_1 = arith.constant 0 : i32
    return %c0_i32, %c0_i32_0 : i32, i32
  }
  func.func @transform_5(%arg0: i32) -> (i32, i32) {
    %c0_i32 = arith.constant 0 : i32
    %c0_i32_0 = arith.constant 0 : i32
    return %arg0, %c0_i32 : i32, i32
  }
  func.func @transform_6(%arg0: i32) -> (i32, i32) {
    %c0_i32 = arith.constant 0 : i32
    %c0_i32_0 = arith.constant 0 : i32
    return %arg0, %c0_i32 : i32, i32
  }
}

</mosaic_0001>

<bundles_post_ra>
// kernel: tpu_custom_call.1
= control target key start
LH: loop header
LB: loop body
LE: loop exit
PB: predicated region body
PF: predicated region fallthrough
CT: control target
= control target key end

     0   :  { %12 = vsyncpa [#allocation4], 0  ;;  %vm30_vm0 = vcmask 261120   ;;  %s482_s0 = inlined_call_operand.vmem [shape: f32[2,8,32], index: 0, kind: input, shape index: {}]   ;;  %s483_s1 = inlined_call_operand.vmem [shape: f32[2,8,32], index: 1, kind: input, shape index: {}]   ;;  %s484_s2 = inlined_call_operand.vmem [shape: f32[2,8], index: 2, kind: input, shape index: {}]   ;;  %s485_s3 = inlined_call_operand.vmem [shape: f32[32,16], index: 3, kind: input, shape index: {}]   ;;  %s486_s4 = inlined_call_operand.vmem [shape: f32[1,16], index: 4, kind: input, shape index: {}]   ;;  %s487_s5 = inlined_call_operand.hbm [shape: f32[2,32], index: 5, kind: output, shape index: {0}]   ;;  %s488_s6 = inlined_call_operand.hbm [shape: f32[2,8], index: 6, kind: output, shape index: {1}]  }
   0x1   :  { %v29_v0 = vld [vmem:[%s485_s3 + $0x18] sm:$0xff]  ;;  %v28_v1 = vld [vmem:[%s485_s3 + $0x10] sm:$0xff]  ;;  %v24_v2 = vld [vmem:[%s482_s0] sm:$0xff] }
   0x2   :  { %309 = vmatprep.subr.mxu0 %v29_v0  ;;  %v27_v3 = vld [vmem:[%s485_s3 + $0x8] sm:$0xff]  ;;  %317 = vmatprep.mubr.msk.f32.mxu0 %vm30_vm0, %v24_v2 }
   0x3   :  { %310 = vmatpush3.msra.mxu0 %v29_v0 }
   0x4   :  { %13 = vsyncpa [#allocation6], 0  ;;  %311 = vmatprep.subr.mxu0 %v28_v1  ;;  %v26_v4 = vld [vmem:[%s485_s3] sm:$0xff]  ;;  %v25_v5 = vld [vmem:[%s482_s0 + $0x8] sm:$0xff]  ;;  %v132_v6 = vlaneseq  ;;  %vm123_vm1 = vcmask 130048   ;;  %v379_v24 = vmov 0  }
   0x5   :  { %312 = vmatpush3.msra.mxu0 %v28_v1  ;;  %v130_v9 = vld [vmem:[%s484_s2] sm:$0x3]  ;;  %323 = vset.pattern.permute.xlu0 %v379_v24  ;;  %vm168_vm2 = vcmask 1041409   ;;  %vm171_vm3 = vcmask 58368   ;;  %v247_v61 = vld [vmem:[%s483_s1 + $0x8] sm:$0xff]  ;;  %s380_s13 = smov [#allocation5]  }
   0x6   :  { %313 = vmatprep.subr.mxu0 %v27_v3  ;;  %v133_v7 = vshrl.u32 %v132_v6, 7  ;;  %v159_v8 = vand.u32 127, %v132_v6  ;;  %v302_v19 = vld [vmem:[%s486_s4] ss:$0 sm:$0xff]  ;;  %324 = vset.pattern.permute.xlu1 %v379_v24  ;;  %s288_s14 = sshll.u32 %s380_s13, 4  ;;  %s289_s14 = int_to_ptr.vmem [resolvable:$true] %s288_s14 }
   0x7   :  { %314 = vmatpush3.msra.mxu0 %v27_v3  ;;  %v246_v58 = vld [vmem:[%s483_s1] sm:$0xff]  ;;  %s335_s1 = scalar_lea.vmem %s289_s14, 32  ;;  %p340_p1 = scmp.lt.s32.totalorder %s289_s14, %s289_s14 }
   0x8   :  { %315 = vmatprep.subr.mxu0 %v26_v4  ;;  %v440_v10 = vsub.s32 0, %v133_v7  ;;  %v442_v11 = vsub.s32 %v159_v8, %v133_v7  ;;  %v444_v12 = vsub.s32 1, %v133_v7  ;;  %p336_p0 = scmp.ne.s32.totalorder %s289_s14, %s335_s1  ;;  %p341_p2 = scmp.lt.s32.totalorder %s335_s1, %s335_s1 }
   0x9   :  { %316 = vmatpush3.msra.mxu0 %v26_v4 }
   0xa   :  { %318 = vmatmul.mubr.msk.f32.vlgmr.msra.gmra.mxu0 %vm30_vm0, %v25_v5  ;;  %v135_v13 = vrot.slane %v130_v9, %v440_v10  ;;  %v142_v14 = vrot.slane %v130_v9, %v444_v12  ;;  %p342_p3 = por %p341_p2, %p340_p1 }
   0xc   :  { %137 = vbcast.lane.b32.xlu1 %v135_v13, 256  ;;  %p343_p4 = pnand %p342_p3, %p336_p0 }
  0x10   :  { %144 = vbcast.lane.b32.xlu1 %v142_v14, 256 }
  0x7e   :  { %v138_v25 = vpop.permute.xlu1 %137 }
  0x82   :  { %v145_v28 = vpop.permute.xlu1 %144 }
  0xca   :  { %v319_v15 = vpop.f32.mrf.mxu0 }
  0xcb   :  { %325 = vtanh.f32 %v319_v15 }
  0xcc   :  { %v103_v16 = vpop.f32.mrf.mxu0 }
  0xcd   :  { %327 = vtanh.f32 %v103_v16 }
  0xd8   :  { %v326_v17 = vpop.eup %325 }
  0xd9   :  { %v122_v22 = vmul.f32 %v326_v17, %v302_v19 }
  0xda   :  { %v328_v18 = vpop.eup %327 }
  0xdb   :  { %v121_v20 = vmul.f32 %v328_v18, %v302_v19  ;;  %v127_v23 = vsel %vm123_vm1, %v122_v22, 0.0 }
  0xdd   :  { %v124_v21 = vsel %vm123_vm1, %v121_v20, 0.0 }
  0xde   :  { %125 = vadd.xlane.f32.xlu0 %v124_v21 }
  0xe2   :  { %128 = vadd.xlane.f32.xlu0 %v127_v23 }
 0x167   :  { %v126_v26 = vpop.xlane.xlu0 %125 }
 0x168   :  { %v148_v27 = vadd.f32 %v138_v25, %v126_v26 }
 0x16a   :  { %153 = vperm.xlu0 %323, %v148_v27  }
 0x16b   :  { %v129_v29 = vpop.xlane.xlu0 %128 }
 0x16c   :  { %v149_v30 = vadd.f32 %v145_v28, %v129_v29 }
 0x16e   :  { %156 = vperm.xlu1 %324, %v149_v30  }
 0x1e5   :  { %v154_v31 = vpop.permute.xlu0 %153 }
 0x1e6   :  { %v163_v33 = vrot.slane %v154_v31, %v442_v11 }
 0x1e9   :  { %v157_v32 = vpop.permute.xlu1 %156 }
 0x1ea   :  { %v167_v34 = vrot.slane %v157_v32, %v442_v11 }
 0x1ec   :  { %v169_v35 = vsel %vm168_vm2, %v167_v34, %v163_v33 }
 0x1ed   :  { %v172_v36 = vsel %vm171_vm3, %v169_v35, -inf }
 0x1ee   :  { %173 = vmax.xlane.f32.xlu1 %v172_v36 }
 0x277   :  { %v174_v37 = vpop.xlane.xlu1 %173 }
 0x278   :  { %v179_v38 = vrot.slane %v174_v37, %v440_v10  ;;  %v183_v39 = vrot.slane %v174_v37, %v444_v12 }
 0x27a   :  { %v186_v40 = vsub.f32 %v148_v27, %v179_v38  ;;  %v187_v41 = vsub.f32 %v149_v30, %v183_v39 }
 0x27c   :  { %v188_v42 = vmul.f32 1.442695, %v186_v40  ;;  %v190_v43 = vmul.f32 1.442695, %v187_v41 }
 0x27e   :  { %329 = vpow2.f32 %v188_v42 }
 0x27f   :  { %331 = vpow2.f32 %v190_v43 }
 0x28b   :  { %v330_v44 = vpop.eup %329 }
 0x28c   :  { %v332_v45 = vpop.eup %331  ;;  %195 = vperm.xlu1 %324, %v330_v44  }
 0x28d   :  { %198 = vperm.xlu0 %323, %v332_v45  }
 0x307   :  { %v196_v46 = vpop.permute.xlu1 %195 }
 0x308   :  { %v199_v47 = vpop.permute.xlu0 %198  ;;  %v203_v48 = vrot.slane %v196_v46, %v442_v11 }
 0x309   :  { %v207_v49 = vrot.slane %v199_v47, %v442_v11 }
 0x30b   :  { %v208_v50 = vsel %vm168_vm2, %v207_v49, %v203_v48 }
 0x30c   :  { %v210_v51 = vsel %vm171_vm3, %v208_v50, 0.0 }
 0x30d   :  { %211 = vadd.xlane.f32.xlu0 %v210_v51 }
 0x396   :  { %v212_v52 = vpop.xlane.xlu0 %211 }
 0x397   :  { %333 = vrcp.f32 %v212_v52 }
 0x3a4   :  { %v334_v53 = vpop.eup %333 }
 0x3a5   :  { %v218_v54 = vrot.slane %v334_v53, %v440_v10  ;;  %v222_v56 = vrot.slane %v334_v53, %v444_v12 }
 0x3a7   :  { %v225_v55 = vmul.f32 %v330_v44, %v218_v54  ;;  %v226_v57 = vmul.f32 %v332_v45, %v222_v56 }
 0x3a9   :  { %230 = vperm.xlu1 %324, %v225_v55  }
 0x3ad   :  { %233 = vperm.xlu1 %324, %v226_v57  }
 0x424   :  { %v231_v59 = vpop.permute.xlu1 %230 }
 0x425   :  { %v250_v60 = vmul.f32 %v246_v58, %v231_v59  ;;  %v238_v1 = vrot.slane %v231_v59, %v442_v11 }
 0x427   :  { %v252_v62 = vsel %vm30_vm0, %v250_v60, 0.0 }
 0x428   :  { %v253_v63 = vrot.slane %v252_v62, 4  ;;  %v234_v0 = vpop.permute.xlu1 %233 }
 0x429   :  { %v242_v2 = vrot.slane %v234_v0, %v442_v11  ;;  %v251_v3 = vmul.f32 %v247_v61, %v234_v0 }
 0x42a   :  { %v254_v4 = vadd.f32 %v253_v63, %v252_v62 }
 0x42b   :  { %v259_v5 = vsel %vm30_vm0, %v251_v3, 0.0  ;;  %v243_v6 = vsel %vm168_vm2, %v242_v2, %v238_v1 }
 0x42c   :  { %v255_v7 = vrot.slane %v254_v4, 2  ;;  %v260_v8 = vrot.slane %v259_v5, 4  ;;  %245 = vst.msk [vmem:[#allocation5] sm:$0x3] %vm171_vm3, %v243_v6 }
 0x42d   :  { %346 = shalt.err (!%p343_p4)
}
 0x42e   :  { %291 = dma.vmem_to_hbm [thread:$0]  %s289_s14, 32, %s488_s6, [#allocation6]   ;;  %v256_v9 = vadd.f32 %v255_v7, %v254_v4  ;;  %v261_v10 = vadd.f32 %v260_v8, %v259_v5  ;;  %vm270_vm4 = vcmask 254976  }
 0x42f   :  { %s381_s17 = smov [#allocation3]  }
 0x430   :  { %v262_v11 = vrot.slane %v261_v10, 2  ;;  %v257_v13 = vrot.slane %v256_v9, 1  ;;  %s278_s18 = sshll.u32 %s381_s17, 4  ;;  %s279_s18 = int_to_ptr.vmem [resolvable:$true] %s278_s18 }
 0x431   :  { %s355_s19 = scalar_lea.vmem %s279_s18, 32  ;;  %p360_p6 = scmp.lt.s32.totalorder %s279_s18, %s279_s18 }
 0x432   :  { %v263_v12 = vadd.f32 %v262_v11, %v261_v10  ;;  %v258_v15 = vadd.f32 %v257_v13, %v256_v9  ;;  %p356_p5 = scmp.ne.s32.totalorder %s279_s18, %s355_s19  ;;  %p361_p7 = scmp.lt.s32.totalorder %s355_s19, %s355_s19 }
 0x434   :  { %v264_v14 = vrot.slane %v263_v12, 1  ;;  %p362_p8 = por %p361_p7, %p360_p6 }
 0x436   :  { %v265_v16 = vadd.f32 %v264_v14, %v263_v12  ;;  %p363_p9 = pnand %p362_p8, %p356_p5 }
 0x438   :  { %v268_v17 = vsel %vm168_vm2, %v265_v16, %v258_v15 }
 0x439   :  { %271 = vst.msk [vmem:[#allocation3] sm:$0x3] %vm270_vm4, %v268_v17 }
 0x43a   :  { %366 = shalt.err (!%p363_p9)
}
 0x43b   :  { %281 = dma.vmem_to_hbm [thread:$0]  %s279_s18, 32, %s487_s5, [#allocation4]  }
 0x43c   :  { %375 = dma.done.wait [#allocation4], 32  }
 0x43d   :  { %376 = vsyncadd [#allocation4], 4294967264 }
 0x43e   :  { %377 = dma.done.wait [#allocation6], 32  }
 0x43f   :  { %378 = vsyncadd [#allocation6], 4294967264 }
 0x440   :  { %298 = vsyncpa [#allocation4], 1 }
 0x441   :  { %299 = vsyncpa [#allocation6], 1 }

</bundles_post_ra>
